<compile_context>
chip_gen: v5e
topology: v5e:2x2
jax: 0.10.0
libtpu: 0.0.40
codegen_flags: <defaults>
</compile_context>

<pallas_src>
import functools

import jax
import jax.numpy as jnp
from jax.experimental import pallas as pl
from jax.experimental.pallas import tpu as pltpu

NEG_SLOPE = 0.01  # nn.LeakyReLU() default


def _leaky_relu(x):
    return jnp.where(x >= 0, x, NEG_SLOPE * x)


def _round_up(x, m):
    return (x + m - 1) // m * m


def _pad_to(a, shape):
    pads = [(0, t - s) for s, t in zip(a.shape, shape)]
    return jnp.pad(a, pads)


# --------------------------------------------------------------------------- #
# Kernel
# --------------------------------------------------------------------------- #
def resmlp_kernel(x_ref, w1_ref, b1_ref, w11_ref, b11_ref, w12_ref, b12_ref,
                  o_ref):
    # x arrives in f32 (no wrapper-side cast copy); cast to bf16 right before
    # the first MXU op.  All matmuls accumulate in f32 on the MXU; bias add,
    # LeakyReLU and the residual stay in f32 (v5e VPU has no bf16 elementwise).
    x = x_ref[...].astype(jnp.bfloat16)

    # fc1 + LeakyReLU
    h = jnp.dot(x, w1_ref[...], preferred_element_type=jnp.float32) + b1_ref[...]
    h = _leaky_relu(h)

    # fc11 + LeakyReLU (+ Dropout11 == identity in eval)
    dh = jnp.dot(h.astype(jnp.bfloat16), w11_ref[...],
                 preferred_element_type=jnp.float32) + b11_ref[...]
    dh = _leaky_relu(dh)
    # TODO(synk): training-mode dropout (pltpu.prng_seed + stateful_bernoulli)
    # not emitted; forward here matches eval / inference semantics.

    # fc12 + LeakyReLU (+ Dropout12 == identity in eval)
    dh = jnp.dot(dh.astype(jnp.bfloat16), w12_ref[...],
                 preferred_element_type=jnp.float32) + b12_ref[...]
    dh = _leaky_relu(dh)

    # residual
    o_ref[...] = (h + dh).astype(o_ref.dtype)


# --------------------------------------------------------------------------- #
# One-time parameter preparation (hoisted out of the per-call path)
# --------------------------------------------------------------------------- #
def prepare_params(params):
    """Pad the feature dim to a lane-dense multiple of 128 and cast weights to
    bf16.  Call once at init; do NOT re-run per forward call."""
    in_size, out_size = params["w1_t"].shape
    n_pad = _round_up(max(out_size, 128), 128)
    prepared = dict(
        w1=_pad_to(params["w1_t"], (in_size, n_pad)).astype(jnp.bfloat16),
        w11=_pad_to(params["w11_t"], (n_pad, n_pad)).astype(jnp.bfloat16),
        w12=_pad_to(params["w12_t"], (n_pad, n_pad)).astype(jnp.bfloat16),
        b1=_pad_to(params["b1"], (1, n_pad)).astype(jnp.float32),
        b11=_pad_to(params["b11"], (1, n_pad)).astype(jnp.float32),
        b12=_pad_to(params["b12"], (1, n_pad)).astype(jnp.float32),
    )
    return prepared, out_size


# --------------------------------------------------------------------------- #
# Tiling heuristics
# --------------------------------------------------------------------------- #
_MXU_M = 256                       # MXU M granularity (v6e/v7x); multiple of v5e's 128
_VMEM_BUDGET = 40 * 1024 * 1024    # headroom under v7x's 64 MiB physical VMEM


def _choose_block_b(B, in_size, n_pad, out_itemsize, weight_vmem_bytes):
    # bf16 sublane packing => at least 16 rows; never the old 8-row tiles.
    if B <= 128:
        return _round_up(B, 16)
    if B <= 256:
        # >=2 grid steps so both v7x TensorCores get work on the "parallel" axis.
        return _round_up(-(-B // 2), 16)
    # Large batch: big tiles to amortize the ~0.35us/grid-step overhead, but
    # keep >=2 steps, MXU-M alignment, and fit VMEM
    # (x + out double-buffered per row, plus f32 h/dh temporaries).
    desired = min(2048, _round_up(-(-B // 2), _MXU_M))
    bytes_per_row = (2 * in_size * 4              # x tile, f32, double-buffered
                     + 2 * n_pad * out_itemsize   # out tile, double-buffered
                     + 3 * n_pad * 4)             # h / dh / temp, f32
    avail = max(_VMEM_BUDGET - weight_vmem_bytes, _MXU_M * bytes_per_row)
    max_rows = max(_MXU_M, (avail // bytes_per_row) // _MXU_M * _MXU_M)
    return max(_MXU_M, min(desired, max_rows))


# --------------------------------------------------------------------------- #
# Forward
# --------------------------------------------------------------------------- #
@functools.partial(
    jax.jit,
    static_argnames=("out_size", "block_b", "out_dtype", "trim_features"))
def resmlp_forward(x, prepared, out_size, block_b=None,
                   out_dtype=jnp.bfloat16, trim_features=True):
    """x: [B, input_size] f32; prepared: dict from prepare_params()."""
    B, in_size = x.shape
    n_pad = prepared["w1"].shape[1]
    out_dtype = jnp.dtype(out_dtype)
    out_itemsize = out_dtype.itemsize

    # Constant-index weights: single-buffer at large hidden dims (saves VMEM,
    # mainly for v7x's 64 MiB); keep default double-buffering otherwise.
    n_wbuf = 1 if n_pad >= 1024 else 2
    weight_vmem = (n_wbuf * (in_size * n_pad + 2 * n_pad * n_pad) * 2
                   + 2 * 3 * n_pad * 4)

    if block_b is None:
        block_b = _choose_block_b(B, in_size, n_pad, out_itemsize, weight_vmem)
    block_b = max(16, int(block_b))

    # Ragged last block is handled by Pallas (OOB rows never written to HBM);
    # no explicit batch zero-pad copy needed.
    grid = (pl.cdiv(B, block_b),)

    # VMEM estimate -> raise scoped limit only when the default would be tight.
    bytes_per_row = 2 * in_size * 4 + 2 * n_pad * out_itemsize + 3 * n_pad * 4
    vmem_est = weight_vmem + block_b * bytes_per_row
    vmem_limit = None
    if vmem_est > 12 * 1024 * 1024:
        vmem_limit = min(vmem_est + 8 * 1024 * 1024, 60 * 1024 * 1024)

    wmode = pl.Buffered(1) if n_wbuf == 1 else None

    def full_spec(shape, mode=None):
        idx = lambda i: (0,) * len(shape)
        if mode is None:
            return pl.BlockSpec(shape, idx)
        return pl.BlockSpec(shape, idx, pipeline_mode=mode)

    flops = 2 * B * (in_size * n_pad + 2 * n_pad * n_pad)
    bytes_accessed = (B * in_size * 4                              # x (f32)
                      + B * n_pad * out_itemsize                   # out
                      + (in_size * n_pad + 2 * n_pad * n_pad) * 2  # weights bf16
                      + 3 * n_pad * 4)                             # biases f32

    out_padded = pl.pallas_call(
        resmlp_kernel,
        out_shape=jax.ShapeDtypeStruct((B, n_pad), out_dtype),
        grid_spec=pltpu.PrefetchScalarGridSpec(
            num_scalar_prefetch=0,
            grid=grid,
            in_specs=[
                pl.BlockSpec((block_b, in_size), lambda i: (i, 0)),  # x tile (f32)
                full_spec(prepared["w1"].shape, wmode),
                full_spec(prepared["b1"].shape),
                full_spec(prepared["w11"].shape, wmode),
                full_spec(prepared["b11"].shape),
                full_spec(prepared["w12"].shape, wmode),
                full_spec(prepared["b12"].shape),
            ],
            out_specs=pl.BlockSpec((block_b, n_pad), lambda i: (i, 0)),
        ),
        compiler_params=pltpu.CompilerParams(
            dimension_semantics=("parallel",),
            vmem_limit_bytes=vmem_limit,
        ),
        cost_estimate=pl.CostEstimate(
            flops=flops, transcendentals=0, bytes_accessed=bytes_accessed),
    )(x, prepared["w1"], prepared["b1"], prepared["w11"], prepared["b11"],
      prepared["w12"], prepared["b12"])

    if trim_features and out_size != n_pad:
        # Only when features were padded; skip via trim_features=False to let
        # the consumer fuse/absorb the slice instead of materializing a copy.
        return out_padded[:, :out_size]
    return out_padded


# --------------------------------------------------------------------------- #
# Init + references
# --------------------------------------------------------------------------- #
def init_params(key, input_size, output_size, dtype=jnp.float32):
    """Deterministic synthetic init (mimics nn.Linear uniform(-1/sqrt(fan_in), +))."""
    keys = jax.random.split(key, 6)

    def linear(kw, kb, fan_in, fan_out):
        bound = 1.0 / jnp.sqrt(jnp.asarray(fan_in, dtype=jnp.float32))
        # Stored already transposed: [in, out]
        w_t = jax.random.uniform(kw, (fan_in, fan_out), dtype, -bound, bound)
        b = jax.random.uniform(kb, (1, fan_out), dtype, -bound, bound)
        return w_t, b

    w1_t, b1 = linear(keys[0], keys[1], input_size, output_size)
    w11_t, b11 = linear(keys[2], keys[3], output_size, output_size)
    w12_t, b12 = linear(keys[4], keys[5], output_size, output_size)
    return dict(w1_t=w1_t, b1=b1, w11_t=w11_t, b11=b11, w12_t=w12_t, b12=b12)


def resmlp_ref(x, p):
    """Pure-JAX reference mirroring the kernel's numerics (bf16 MXU inputs, f32 acc)."""
    bf = lambda a: a.astype(jnp.bfloat16)
    h = _leaky_relu(
        jnp.dot(bf(x), bf(p["w1_t"]), preferred_element_type=jnp.float32) + p["b1"])
    dh = _leaky_relu(
        jnp.dot(bf(h), bf(p["w11_t"]), preferred_element_type=jnp.float32) + p["b11"])
    dh = _leaky_relu(
        jnp.dot(bf(dh), bf(p["w12_t"]), preferred_element_type=jnp.float32) + p["b12"])
    return h + dh


def resmlp_ref_f32(x, p):
    """Full-f32 reference (matches PyTorch eval-mode forward in math)."""
    h = _leaky_relu(x @ p["w1_t"] + p["b1"])
    dh = _leaky_relu(h @ p["w11_t"] + p["b11"])
    dh = _leaky_relu(dh @ p["w12_t"] + p["b12"])
    return h + dh


if __name__ == "__main__":
    key = jax.random.PRNGKey(0)
    k_x, k_p, k_x2 = jax.random.split(key, 3)

    batch = 16
    input_size = 32
    output_size = 64

    x = jax.random.normal(k_x, (batch, input_size), jnp.float32)
    params = init_params(k_p, input_size, output_size)
    prepared, out_size = prepare_params(params)   # once, outside the call path

    # Default path: bf16 output (HBM-bound kernel -> halves output bytes).
    out = jax.block_until_ready(resmlp_forward(x, prepared, out_size))
    assert out.shape == (batch, output_size), out.shape
    assert out.dtype == jnp.bfloat16, out.dtype

    out_f = out.astype(jnp.float32)
    ref = resmlp_ref(x, params)       # bf16-matmul / f32-elementwise reference
    assert jnp.allclose(out_f, ref, atol=2e-2, rtol=2e-2), \
        float(jnp.abs(out_f - ref).max())

    ref32 = resmlp_ref_f32(x, params)  # full-f32 PyTorch-equivalent math
    assert jnp.allclose(out_f, ref32, atol=4e-2, rtol=4e-2), \
        float(jnp.abs(out_f - ref32).max())

    # f32 output + ragged batch (B not a multiple of the row tile).
    x2 = jax.random.normal(k_x2, (13, input_size), jnp.float32)
    out2 = jax.block_until_ready(
        resmlp_forward(x2, prepared, out_size, out_dtype=jnp.float32))
    assert out2.shape == (13, output_size), out2.shape
    ref2 = resmlp_ref(x2, params)
    assert jnp.allclose(out2, ref2, atol=2e-3, rtol=2e-3), \
        float(jnp.abs(out2 - ref2).max())

    print("KERNEL_OK")
</pallas_src>

<mosaic_0001>
module attributes {stable_mosaic.version = 11 : i64} {
  func.func @resmlp_kernel(%arg0: i32, %arg1: memref<16x32xf32, #tpu.memory_space<vmem>>, %arg2: memref<32x128xbf16, #tpu.memory_space<vmem>>, %arg3: memref<1x128xf32, #tpu.memory_space<vmem>>, %arg4: memref<128x128xbf16, #tpu.memory_space<vmem>>, %arg5: memref<1x128xf32, #tpu.memory_space<vmem>>, %arg6: memref<128x128xbf16, #tpu.memory_space<vmem>>, %arg7: memref<1x128xf32, #tpu.memory_space<vmem>>, %arg8: memref<16x128xbf16, #tpu.memory_space<vmem>>) attributes {dimension_semantics = [#tpu.dimension_semantics<parallel>], iteration_bounds = array<i64: 1>, scalar_prefetch = 0 : i64, scratch_operands = 0 : i64, tpu.core_type = #tpu.core_type<tc>, window_params = [{transform_indices = @transform_0, window_bounds = array<i64: 16, 32>}, {pipeline_mode = #tpu.pipeline_mode<synchronous>, transform_indices = @transform_1, window_bounds = array<i64: 32, 128>}, {pipeline_mode = #tpu.pipeline_mode<synchronous>, transform_indices = @transform_2, window_bounds = array<i64: 1, 128>}, {pipeline_mode = #tpu.pipeline_mode<synchronous>, transform_indices = @transform_3, window_bounds = array<i64: 128, 128>}, {pipeline_mode = #tpu.pipeline_mode<synchronous>, transform_indices = @transform_4, window_bounds = array<i64: 1, 128>}, {pipeline_mode = #tpu.pipeline_mode<synchronous>, transform_indices = @transform_5, window_bounds = array<i64: 128, 128>}, {pipeline_mode = #tpu.pipeline_mode<synchronous>, transform_indices = @transform_6, window_bounds = array<i64: 1, 128>}, {transform_indices = @transform_7, window_bounds = array<i64: 16, 128>}]} {
    %c0 = arith.constant 0 : index
    %c0_0 = arith.constant 0 : index
    %0 = vector.load %arg1[%c0, %c0_0] : memref<16x32xf32, #tpu.memory_space<vmem>>, vector<16x32xf32>
    %1 = arith.truncf %0 : vector<16x32xf32> to vector<16x32xbf16>
    %c0_1 = arith.constant 0 : index
    %c0_2 = arith.constant 0 : index
    %2 = vector.load %arg2[%c0_1, %c0_2] : memref<32x128xbf16, #tpu.memory_space<vmem>>, vector<32x128xbf16>
    %cst = arith.constant dense<0.000000e+00> : vector<16x128xf32>
    %3 = tpu.matmul %1, %2, %cst {dimension_numbers = #tpu.dot_dimension_numbers<[1], [0], [0], [1], [0, 0, 1, 1], [], []>} : vector<16x32xbf16>, vector<32x128xbf16>, vector<16x128xf32> -> vector<16x128xf32>
    %c0_3 = arith.constant 0 : index
    %c0_4 = arith.constant 0 : index
    %4 = vector.load %arg3[%c0_3, %c0_4] : memref<1x128xf32, #tpu.memory_space<vmem>>, vector<1x128xf32>
    %5 = vector.broadcast %4 : vector<1x128xf32> to vector<16x128xf32>
    %6 = arith.addf %3, %5 : vector<16x128xf32>
    %cst_5 = arith.constant 0.000000e+00 : f32
    %7 = vector.broadcast %cst_5 : f32 to vector<16x128xf32>
    %8 = arith.cmpf oge, %6, %7 : vector<16x128xf32>
    %cst_6 = arith.constant 0.00999999977 : f32
    %9 = vector.broadcast %cst_6 : f32 to vector<16x128xf32>
    %10 = arith.mulf %9, %6 : vector<16x128xf32>
    %11 = arith.select %8, %6, %10 : vector<16x128xi1>, vector<16x128xf32>
    %12 = arith.truncf %11 : vector<16x128xf32> to vector<16x128xbf16>
    %c0_7 = arith.constant 0 : index
    %c0_8 = arith.constant 0 : index
    %13 = vector.load %arg4[%c0_7, %c0_8] : memref<128x128xbf16, #tpu.memory_space<vmem>>, vector<128x128xbf16>
    %cst_9 = arith.constant dense<0.000000e+00> : vector<16x128xf32>
    %14 = tpu.matmul %12, %13, %cst_9 {dimension_numbers = #tpu.dot_dimension_numbers<[1], [0], [0], [1], [0, 0, 1, 1], [], []>} : vector<16x128xbf16>, vector<128x128xbf16>, vector<16x128xf32> -> vector<16x128xf32>
    %c0_10 = arith.constant 0 : index
    %c0_11 = arith.constant 0 : index
    %15 = vector.load %arg5[%c0_10, %c0_11] : memref<1x128xf32, #tpu.memory_space<vmem>>, vector<1x128xf32>
    %16 = vector.broadcast %15 : vector<1x128xf32> to vector<16x128xf32>
    %17 = arith.addf %14, %16 : vector<16x128xf32>
    %cst_12 = arith.constant 0.000000e+00 : f32
    %18 = vector.broadcast %cst_12 : f32 to vector<16x128xf32>
    %19 = arith.cmpf oge, %17, %18 : vector<16x128xf32>
    %cst_13 = arith.constant 0.00999999977 : f32
    %20 = vector.broadcast %cst_13 : f32 to vector<16x128xf32>
    %21 = arith.mulf %20, %17 : vector<16x128xf32>
    %22 = arith.select %19, %17, %21 : vector<16x128xi1>, vector<16x128xf32>
    %23 = arith.truncf %22 : vector<16x128xf32> to vector<16x128xbf16>
    %c0_14 = arith.constant 0 : index
    %c0_15 = arith.constant 0 : index
    %24 = vector.load %arg6[%c0_14, %c0_15] : memref<128x128xbf16, #tpu.memory_space<vmem>>, vector<128x128xbf16>
    %cst_16 = arith.constant dense<0.000000e+00> : vector<16x128xf32>
    %25 = tpu.matmul %23, %24, %cst_16 {dimension_numbers = #tpu.dot_dimension_numbers<[1], [0], [0], [1], [0, 0, 1, 1], [], []>} : vector<16x128xbf16>, vector<128x128xbf16>, vector<16x128xf32> -> vector<16x128xf32>
    %c0_17 = arith.constant 0 : index
    %c0_18 = arith.constant 0 : index
    %26 = vector.load %arg7[%c0_17, %c0_18] : memref<1x128xf32, #tpu.memory_space<vmem>>, vector<1x128xf32>
    %27 = vector.broadcast %26 : vector<1x128xf32> to vector<16x128xf32>
    %28 = arith.addf %25, %27 : vector<16x128xf32>
    %cst_19 = arith.constant 0.000000e+00 : f32
    %29 = vector.broadcast %cst_19 : f32 to vector<16x128xf32>
    %30 = arith.cmpf oge, %28, %29 : vector<16x128xf32>
    %cst_20 = arith.constant 0.00999999977 : f32
    %31 = vector.broadcast %cst_20 : f32 to vector<16x128xf32>
    %32 = arith.mulf %31, %28 : vector<16x128xf32>
    %33 = arith.select %30, %28, %32 : vector<16x128xi1>, vector<16x128xf32>
    %34 = arith.addf %11, %33 : vector<16x128xf32>
    %35 = arith.truncf %34 : vector<16x128xf32> to vector<16x128xbf16>
    %c0_21 = arith.constant 0 : index
    %c0_22 = arith.constant 0 : index
    %36 = vector.load %arg8[%c0_21, %c0_22] : memref<16x128xbf16, #tpu.memory_space<vmem>>, vector<16x128xbf16>
    tpu.vector_store %arg8[%c0_21, %c0_22], %35 {strides = array<i32>} : memref<16x128xbf16, #tpu.memory_space<vmem>>, vector<16x128xbf16>,
    return
  }
  func.func @transform_0(%arg0: i32) -> (i32, i32) {
    %c0_i32 = arith.constant 0 : i32
    %c0_i32_0 = arith.constant 0 : i32
    return %arg0, %c0_i32 : i32, i32
  }
  func.func @transform_1(%arg0: i32) -> (i32, i32) {
    %c0_i32 = arith.constant 0 : i32
    %c0_i32_0 = arith.constant 0 : i32
    %c0_i32_1 = arith.constant 0 : i32
    return %c0_i32, %c0_i32_0 : i32, i32
  }
  func.func @transform_2(%arg0: i32) -> (i32, i32) {
    %c0_i32 = arith.constant 0 : i32
    %c0_i32_0 = arith.constant 0 : i32
    %c0_i32_1 = arith.constant 0 : i32
    return %c0_i32, %c0_i32_0 : i32, i32
  }
  func.func @transform_3(%arg0: i32) -> (i32, i32) {
    %c0_i32 = arith.constant 0 : i32
    %c0_i32_0 = arith.constant 0 : i32
    %c0_i32_1 = arith.constant 0 : i32
    return %c0_i32, %c0_i32_0 : i32, i32
  }
  func.func @transform_4(%arg0: i32) -> (i32, i32) {
    %c0_i32 = arith.constant 0 : i32
    %c0_i32_0 = arith.constant 0 : i32
    %c0_i32_1 = arith.constant 0 : i32
    return %c0_i32, %c0_i32_0 : i32, i32
  }
  func.func @transform_5(%arg0: i32) -> (i32, i32) {
    %c0_i32 = arith.constant 0 : i32
    %c0_i32_0 = arith.constant 0 : i32
    %c0_i32_1 = arith.constant 0 : i32
    return %c0_i32, %c0_i32_0 : i32, i32
  }
  func.func @transform_6(%arg0: i32) -> (i32, i32) {
    %c0_i32 = arith.constant 0 : i32
    %c0_i32_0 = arith.constant 0 : i32
    %c0_i32_1 = arith.constant 0 : i32
    return %c0_i32, %c0_i32_0 : i32, i32
  }
  func.func @transform_7(%arg0: i32) -> (i32, i32) {
    %c0_i32 = arith.constant 0 : i32
    %c0_i32_0 = arith.constant 0 : i32
    return %arg0, %c0_i32 : i32, i32
  }
}

</mosaic_0001>

<bundles_post_ra>
// kernel: resmlp_forward.1
= control target key start
LH: loop header
LB: loop body
LE: loop exit
PB: predicated region body
PF: predicated region fallthrough
CT: control target
= control target key end

     0   :  { %12 = vsyncpa [#allocation3], 0  ;;  %s703_s0 = inlined_call_operand.hbm [shape: f32[16,32], index: 0, kind: input, shape index: {}]   ;;  %s704_s1 = inlined_call_operand.hbm [shape: bf16[32,128], index: 1, kind: input, shape index: {}]   ;;  %s705_s2 = inlined_call_operand.hbm [shape: f32[1,128], index: 2, kind: input, shape index: {}]   ;;  %s706_s3 = inlined_call_operand.hbm [shape: bf16[128,128], index: 3, kind: input, shape index: {}]   ;;  %s707_s4 = inlined_call_operand.vmem [shape: f32[1,128], index: 4, kind: input, shape index: {}]   ;;  %s708_s5 = inlined_call_operand.hbm [shape: bf16[128,128], index: 5, kind: input, shape index: {}]   ;;  %s709_s6 = inlined_call_operand.vmem [shape: f32[1,128], index: 6, kind: input, shape index: {}]   ;;  %s710_s7 = inlined_call_operand.hbm [shape: bf16[16,128], index: 7, kind: output, shape index: {}]  }
   0x1   :  { %13 = vsyncpa [#allocation6], 0 }
   0x2   :  { %14 = vsyncpa [#allocation9], 0  ;;  %s33_s26 = sshll.u32 %s704_s1, 4  ;;  %s34_s26 = int_to_ptr.hbm [resolvable:$true] %s33_s26 }
   0x3   :  { %15 = vsyncpa [#allocation4], 0  ;;  %s617_s27 = smov [#allocation5]   ;;  %s57_s8 = sshll.u32 %s706_s3, 4  ;;  %s58_s8 = int_to_ptr.hbm [resolvable:$true] %s57_s8 }
   0x4   :  { %s35_s28 = sshll.u32 %s617_s27, 4  ;;  %s618_s9 = smov 64   ;;  %s36_s28 = int_to_ptr.vmem [resolvable:$true] %s35_s28 }
   0x5   :  { %s619_s10 = smov 4   ;;  %s620_s11 = smov [#allocation8]  }
   0x6   :  { %41 = dma.hbm_to_vmem [thread:$0]  %s34_s26, 256, %s36_s28, [#allocation6], %s618_s9, %s618_s9, %s619_s10  }
   0x7   :  { %s59_s12 = sshll.u32 %s620_s11, 4  ;;  %s20_s14 = sshll.u32 %s703_s0, 4  ;;  %s60_s12 = int_to_ptr.vmem [resolvable:$true] %s59_s12  ;;  %s21_s14 = int_to_ptr.hbm [resolvable:$true] %s20_s14 }
   0x8   :  { %65 = dma.hbm_to_vmem [thread:$0]  %s58_s8, 1024, %s60_s12, [#allocation9], %s618_s9, %s618_s9, %s619_s10  }
   0x9   :  { %s621_s3 = smov [#allocation2]   ;;  %s47_s18 = sshll.u32 %s705_s2, 4  ;;  %s48_s18 = int_to_ptr.hbm [resolvable:$true] %s47_s18 }
   0xa   :  { %s22_s15 = sshll.u32 %s621_s3, 4  ;;  %s622_s19 = smov 128   ;;  %s23_s15 = int_to_ptr.vmem [resolvable:$true] %s22_s15 }
   0xb   :  { %s623_s20 = smov 8   ;;  %s624_s21 = smov [#allocation7]  }
   0xc   :  { %28 = dma.hbm_to_vmem [thread:$0]  %s21_s14, 256, %s23_s15, [#allocation3], %s622_s19, %s622_s19, %s623_s20  }
   0xd   :  { %s49_s22 = sshll.u32 %s624_s21, 4  ;;  %s72_s24 = sshll.u32 %s708_s5, 4  ;;  %s50_s22 = int_to_ptr.vmem [resolvable:$true] %s49_s22  ;;  %s73_s24 = int_to_ptr.hbm [resolvable:$true] %s72_s24 }
   0xe   :  { %52 = dma.hbm_to_vmem [thread:$0]  %s48_s18, 16, %s50_s22, [#allocation6]  }
   0xf   :  { %s625_s25 = smov [#allocation10]  }
  0x10   :  { %s74_s26 = sshll.u32 %s625_s25, 4  ;;  %s75_s26 = int_to_ptr.vmem [resolvable:$true] %s74_s26 }
  0x11   :  { %80 = dma.hbm_to_vmem [thread:$0]  %s73_s24, 1024, %s75_s26, [#allocation9], %s618_s9, %s618_s9, %s619_s10  }
  0x12   :  { %609 = dma.done.wait [#allocation3], 256  }
  0x13   :  { %610 = vsyncadd [#allocation3], 4294967040 }
  0x14   :  { %611 = dma.done.wait [#allocation6], 272  }
  0x15   :  { %612 = vsyncadd [#allocation6], 4294967024 }
  0x16   :  { %613 = dma.done.wait [#allocation9], 2048  }
  0x17   :  { %614 = vsyncadd [#allocation9], 4294965248  ;;  %v430_v0 = vld [vmem:[#allocation5 + $0x8] sm:$0xff]  ;;  %v429_v1 = vld [vmem:[#allocation5] sm:$0xff]  ;;  %vm127_vm0 = vcmask 261120   ;;  %s341_s11 = sshll.u32 %s710_s7, 4  ;;  %s342_s11 = int_to_ptr.hbm [resolvable:$true] %s341_s11 }
  0x18   :  { %v438_v2 = vld [vmem:[#allocation8 + $0x38] sm:$0xff]  ;;  %137 = vmatpush.bf16.msra.mxu0 %v430_v0  ;;  %v105_v4 = vld [vmem:[#allocation2 + $0x8] sm:$0xff]  ;;  %v437_v5 = vld [vmem:[#allocation8 + $0x30] sm:$0xff] }
  0x19   :  { %v104_v3 = vld [vmem:[#allocation2] sm:$0xff]  ;;  %220 = vmatpush.bf16.msra.mxu1 %v438_v2  ;;  %v436_v7 = vld [vmem:[#allocation8 + $0x28] sm:$0xff]  ;;  %v433_v10 = vld [vmem:[#allocation8 + $0x10] sm:$0xff] }
  0x1a   :  { %v106_v6 = vpack.c.bf16 %v105_v4, %v104_v3  ;;  %v435_v8 = vld [vmem:[#allocation8 + $0x20] sm:$0xff]  ;;  %v434_v9 = vld [vmem:[#allocation8 + $0x18] sm:$0xff]  ;;  %v432_v11 = vld [vmem:[#allocation8 + $0x8] sm:$0xff] }
  0x1b   :  { %v431_v12 = vld [vmem:[#allocation8] sm:$0xff]  ;;  %v446_v13 = vld [vmem:[#allocation10 + $0x38] sm:$0xff]  ;;  %v445_v14 = vld [vmem:[#allocation10 + $0x30] sm:$0xff] }
  0x1c   :  { %138 = vmatpush.bf16.msra.mxu0 %v429_v1  ;;  %309 = vmatpush.bf16.msra.mxu2 %v446_v13  ;;  %v444_v15 = vld [vmem:[#allocation10 + $0x28] sm:$0xff]  ;;  %v443_v16 = vld [vmem:[#allocation10 + $0x20] sm:$0xff]  ;;  %v462_v18 = vld [vmem:[#allocation7] ss:$0 sm:$0xff] }
  0x1d   :  { %221 = vmatpush.bf16.msra.mxu1 %v437_v5  ;;  %v442_v27 = vld [vmem:[#allocation10 + $0x18] sm:$0xff]  ;;  %v441_v28 = vld [vmem:[#allocation10 + $0x10] sm:$0xff]  ;;  %v440_v29 = vld [vmem:[#allocation10 + $0x8] sm:$0xff] }
  0x1e   :  { %v439_v30 = vld [vmem:[#allocation10] sm:$0xff]  ;;  %v463_v32 = vld [vmem:[%s707_s4] ss:$0 sm:$0xff]  ;;  %s626_s4 = smov [#allocation11]  }
  0x1f   :  { %364 = vmatmul.msk.bf16.vlgmr.msra.gmra.mxu0 %vm127_vm0, %v106_v6  ;;  %v464_v41 = vld [vmem:[%s709_s6] ss:$0 sm:$0xff]  ;;  %s339_s29 = sshll.u32 %s626_s4, 4  ;;  %s340_s29 = int_to_ptr.vmem [resolvable:$true] %s339_s29 }
  0x20   :  { %310 = vmatpush.bf16.msra.mxu2 %v445_v14 }
  0x21   :  { %222 = vmatpush.bf16.msra.mxu1 %v436_v7 }
  0x24   :  { %311 = vmatpush.bf16.msra.mxu2 %v444_v15 }
  0x25   :  { %223 = vmatpush.bf16.msra.mxu1 %v435_v8 }
  0x28   :  { %312 = vmatpush.bf16.msra.mxu2 %v443_v16 }
  0x29   :  { %224 = vmatpush.bf16.msra.mxu1 %v434_v9 }
  0x2c   :  { %313 = vmatpush.bf16.msra.mxu2 %v442_v27 }
  0x2d   :  { %225 = vmatpush.bf16.msra.mxu1 %v433_v10 }
  0x30   :  { %314 = vmatpush.bf16.msra.mxu2 %v441_v28 }
  0x31   :  { %226 = vmatpush.bf16.msra.mxu1 %v432_v11 }
  0x34   :  { %315 = vmatpush.bf16.msra.mxu2 %v440_v29 }
  0x35   :  { %227 = vmatpush.bf16.msra.mxu1 %v431_v12 }
  0x38   :  { %316 = vmatpush.bf16.msra.mxu2 %v439_v30 }
  0x9c   :  { %v140_v17 = vpop.f32.mrf.mxu0 }
  0x9d   :  { %v141_v19 = vadd.f32 %v462_v18, %v140_v17 }
  0x9f   :  { %v147_v21 = vmul.f32 0.01, %v141_v19  ;;  %vm145_vm1 = vcmp.ge.f32.partialorder %v141_v19, 0.0 }
  0xa1   :  { %v149_v24 = vsel %vm145_vm1, %v141_v19, %v147_v21 }
  0xa4   :  { %v142_v20 = vpop.f32.mrf.mxu0 }
  0xa5   :  { %v143_v22 = vadd.f32 %v462_v18, %v142_v20 }
  0xa7   :  { %v148_v23 = vmul.f32 0.01, %v143_v22  ;;  %vm146_vm2 = vcmp.ge.f32.partialorder %v143_v22, 0.0 }
  0xa9   :  { %v150_v25 = vsel %vm146_vm2, %v143_v22, %v148_v23 }
  0xaa   :  { %v151_v26 = vpack.c.bf16 %v150_v25, %v149_v24 }
  0xac   :  { %228 = vmatmul.bf16.vlgmr.msra.gmra.mxu1 %v151_v26 }
 0x129   :  { %v229_v31 = vpop.f32.mrf.mxu1 }
 0x12a   :  { %v230_v33 = vadd.f32 %v463_v32, %v229_v31 }
 0x12c   :  { %v236_v35 = vmul.f32 0.01, %v230_v33  ;;  %vm234_vm3 = vcmp.ge.f32.partialorder %v230_v33, 0.0 }
 0x12e   :  { %v238_v38 = vsel %vm234_vm3, %v230_v33, %v236_v35 }
 0x131   :  { %v231_v34 = vpop.f32.mrf.mxu1 }
 0x132   :  { %v232_v36 = vadd.f32 %v463_v32, %v231_v34 }
 0x134   :  { %v237_v37 = vmul.f32 0.01, %v232_v36  ;;  %vm235_vm4 = vcmp.ge.f32.partialorder %v232_v36, 0.0 }
 0x136   :  { %v239_v39 = vsel %vm235_vm4, %v232_v36, %v237_v37 }
 0x137   :  { %v240_v40 = vpack.c.bf16 %v239_v39, %v238_v38 }
 0x139   :  { %317 = vmatmul.bf16.vlgmr.msra.gmra.mxu2 %v240_v40 }
 0x1bc   :  { %v318_v42 = vpop.f32.mrf.mxu2 }
 0x1bd   :  { %v319_v43 = vadd.f32 %v464_v41, %v318_v42 }
 0x1bf   :  { %v325_v44 = vmul.f32 0.01, %v319_v43  ;;  %vm323_vm5 = vcmp.ge.f32.partialorder %v319_v43, 0.0 }
 0x1c1   :  { %v327_v47 = vsel %vm323_vm5, %v319_v43, %v325_v44 }
 0x1c2   :  { %v329_v50 = vadd.f32 %v327_v47, %v149_v24 }
 0x1c4   :  { %v320_v45 = vpop.f32.mrf.mxu2 }
 0x1c5   :  { %v321_v46 = vadd.f32 %v464_v41, %v320_v45 }
 0x1c7   :  { %vm324_vm6 = vcmp.ge.f32.partialorder %v321_v46, 0.0  ;;  %v326_v48 = vmul.f32 0.01, %v321_v46 }
 0x1c9   :  { %v328_v49 = vsel %vm324_vm6, %v321_v46, %v326_v48 }
 0x1ca   :  { %v330_v51 = vadd.f32 %v328_v49, %v150_v25 }
 0x1cc   :  { %v450_v52 = vpack.c.bf16 %v330_v51, %v329_v50 }
 0x1ce   :  { %451 = vst [vmem:[#allocation11] sm:$0xff] %v450_v52  }
 0x1cf   :  { %347 = dma.vmem_to_hbm [thread:$0]  %s340_s29, 128, %s342_s11, [#allocation4], %s618_s9, %s618_s9, %s619_s10  }
 0x1d0   :  { %615 = dma.done.wait [#allocation4], 128  }
 0x1d1   :  { %616 = vsyncadd [#allocation4], 4294967168 }
 0x1d2   :  { %352 = vsyncpa [#allocation3], 1 }
 0x1d3   :  { %353 = vsyncpa [#allocation6], 1 }
 0x1d4   :  { %354 = vsyncpa [#allocation9], 1 }
 0x1d5   :  { %355 = vsyncpa [#allocation4], 1 }

</bundles_post_ra>
